<compile_context>
chip_gen: v7x
topology: tpu7x:2x2x1
jax: 0.10.0
libtpu: 0.0.40
codegen_flags: <defaults>
</compile_context>

<pallas_src>
import functools

import jax
import jax.numpy as jnp
from jax.experimental import pallas as pl
from jax.experimental.pallas import tpu as pltpu


def _round_up(x, m):
    return (x + m - 1) // m * m


def _vmem_capacity_bytes():
    # Trace-time hardware query; fall back to the most conservative value
    # (v7x: 64 MiB per TensorCore) if the query is unavailable.
    try:
        return int(pltpu.get_tpu_info().vmem_capacity_bytes)
    except Exception:
        return 64 * 1024 * 1024


def _vit_output_kernel(x_ref, w_ref, b_ref, res_ref, o_ref, *, mxu_dtype):
    # Fused: dense (MXU matmul, f32 accumulation) + bias + residual add.
    # Dropout is identity in eval mode, so it is intentionally omitted.
    x = x_ref[...]
    w = w_ref[...]
    if mxu_dtype is not None:
        # In-kernel cast: x is f32 in HBM/VMEM (so the 8-sublane f32 layout
        # applies; bf16 exists only as a compute temporary).  Weight is already
        # mxu_dtype from the wrapper, so its astype is a no-op.
        x = x.astype(mxu_dtype)
        w = w.astype(mxu_dtype)
    acc = jnp.dot(x, w, preferred_element_type=jnp.float32)
    acc = acc + b_ref[...].astype(jnp.float32)       # broadcast (1, N) over rows
    acc = acc + res_ref[...].astype(jnp.float32)     # residual add (elementwise_ops.Add)
    o_ref[...] = acc.astype(o_ref.dtype)


def vit_output(hidden_states, input_tensor, weight, bias, *, tm=None,
               mxu_dtype=jnp.bfloat16, vmem_budget_bytes=None):
    """hidden_states: [B, S, K], input_tensor: [B, S, N],
       weight: [K, N], bias: [N]  ->  [B, S, N]

    mxu_dtype: dtype fed to the MXU (bfloat16 by default; None keeps input dtype
               and gives f32-exact results).
    """
    B, S, K = hidden_states.shape
    N = input_tensor.shape[-1]
    M = B * S
    out_dtype = hidden_states.dtype

    # No wrapper casts / pads of the big M-sized arrays.
    x2d = hidden_states.reshape(M, K)
    r2d = input_tensor.reshape(M, N)
    b2d = bias.reshape(1, N).astype(jnp.float32)
    w = weight if mxu_dtype is None else weight.astype(mxu_dtype)   # tiny: K*N

    x_b = jnp.dtype(x2d.dtype).itemsize
    w_b = jnp.dtype(w.dtype).itemsize
    res_b = jnp.dtype(r2d.dtype).itemsize
    out_b = jnp.dtype(out_dtype).itemsize
    mxu_b = x_b if mxu_dtype is None else jnp.dtype(mxu_dtype).itemsize

    vmem_cap = _vmem_capacity_bytes()
    if vmem_budget_bytes is None:
        # ~5/8 of per-core VMEM: ~40 MiB on v7x (64 MiB), ~80 MiB on v5e/v6e (128 MiB).
        vmem_budget_bytes = vmem_cap * 5 // 8
    if tm is None:
        tm = 512 if vmem_cap >= (96 << 20) else 256

    def vmem_estimate(t):
        return (2 * t * K * x_b               # double-buffered x tiles (original dtype)
                + t * K * mxu_b               # in-kernel cast temporary
                + K * N * w_b                 # resident single-buffered weight
                + _round_up(N, 128) * 4       # bias
                + 2 * t * N * res_b           # double-buffered residual tiles
                + 2 * t * N * out_b           # double-buffered output tiles
                + 2 * t * N * 4)              # f32 accumulator temporaries

    # Row tile: MXU-friendly, shrunk to fit the VMEM budget, never (much) larger
    # than M.  M does NOT have to be a multiple of tm_eff: Pallas handles the
    # ragged last block with masked stores (no cross-row reduction exists here).
    tm_eff = _round_up(min(tm, _round_up(max(M, 8), 8)), 8)
    while tm_eff > 128 and vmem_estimate(tm_eff) > vmem_budget_bytes:
        tm_eff = _round_up(max(128, tm_eff // 2), 8)

    grid_m = pl.cdiv(M, tm_eff)
    # Keep >= 2 grid steps for megacore sharding once M is large enough.
    if grid_m == 1 and M >= 512:
        tm_eff = _round_up(pl.cdiv(M, 2), 128)
        grid_m = pl.cdiv(M, tm_eff)

    # Never request the full physical per-core VMEM (leave Mosaic headroom).
    vmem_hard_cap = min(vmem_cap - (16 << 20), vmem_cap * 7 // 8)
    vmem_limit = int(min(max(vmem_estimate(tm_eff) * 5 // 4 + (4 << 20), 32 << 20),
                         vmem_hard_cap))

    cost = pl.CostEstimate(
        flops=2 * M * K * N + 2 * M * N,
        transcendentals=0,
        bytes_accessed=(M * K * x_b + K * N * w_b + _round_up(N, 128) * 4
                        + M * N * res_b + M * N * out_b),
    )

    kernel = functools.partial(_vit_output_kernel, mxu_dtype=mxu_dtype)

    # NOTE: if hidden_size < 128 (toy configs) the output store is a masked
    # partial store; real ViT hidden_size (768) is lane-dense and unaffected.
    out2d = pl.pallas_call(
        kernel,
        out_shape=jax.ShapeDtypeStruct((M, N), out_dtype),
        grid_spec=pltpu.PrefetchScalarGridSpec(
            num_scalar_prefetch=0,
            grid=(grid_m,),
            in_specs=[
                pl.BlockSpec((tm_eff, K), lambda i: (i, 0)),          # x rows
                pl.BlockSpec((K, N), lambda i: (0, 0),
                             pipeline_mode=pl.Buffered(1)),           # resident weight
                pl.BlockSpec((1, N), lambda i: (0, 0),
                             pipeline_mode=pl.Buffered(1)),           # resident bias
                pl.BlockSpec((tm_eff, N), lambda i: (i, 0)),          # residual rows
            ],
            out_specs=pl.BlockSpec((tm_eff, N), lambda i: (i, 0)),
        ),
        compiler_params=pltpu.CompilerParams(
            dimension_semantics=("parallel",),
            vmem_limit_bytes=vmem_limit,
        ),
        cost_estimate=cost,
    )(x2d, w, b2d, r2d)

    return out2d.reshape(B, S, N)


def vit_output_ref(hidden_states, input_tensor, weight, bias):
    # Pure-JAX reference of ViTOutput.forward (dropout is identity in eval).
    return jnp.einsum("bsk,kn->bsn", hidden_states, weight) + bias + input_tensor


if __name__ == "__main__":
    # Small config consistent with the module: intermediate_size=128, hidden_size=64.
    B, S = 2, 8
    intermediate_size, hidden_size = 128, 64

    key = jax.random.PRNGKey(0)
    k1, k2, k3, k4 = jax.random.split(key, 4)

    hidden_states = jax.random.normal(k1, (B, S, intermediate_size), dtype=jnp.float32)
    input_tensor = jax.random.normal(k2, (B, S, hidden_size), dtype=jnp.float32)
    # Deterministic synthetic parameters (nn.Linear(intermediate_size, hidden_size)).
    weight = (jax.random.normal(k3, (intermediate_size, hidden_size), dtype=jnp.float32)
              * (1.0 / intermediate_size ** 0.5))
    bias = jax.random.normal(k4, (hidden_size,), dtype=jnp.float32) * 0.02

    # 1) Exact-precision path (no bf16 cast) against the f32 reference.
    out_f32 = jax.block_until_ready(
        vit_output(hidden_states, input_tensor, weight, bias, mxu_dtype=None))
    ref_f32 = vit_output_ref(hidden_states, input_tensor, weight, bias)
    assert out_f32.shape == (B, S, hidden_size)
    assert jnp.allclose(out_f32, ref_f32, atol=1e-4, rtol=1e-4)

    # 2) Default fast path: in-kernel bf16 cast for the MXU, f32 accumulation,
    #    f32 bias/residual add.
    out_fast = jax.block_until_ready(
        vit_output(hidden_states, input_tensor, weight, bias))
    ref_fast = vit_output_ref(
        hidden_states.astype(jnp.bfloat16).astype(jnp.float32),
        input_tensor,
        weight.astype(jnp.bfloat16).astype(jnp.float32),
        bias)
    assert out_fast.shape == (B, S, hidden_size)
    assert jnp.allclose(out_fast, ref_fast, atol=2e-3, rtol=2e-3)

    # 3) Ragged token count (M not a multiple of the row tile) exercises the
    #    pad-free masked boundary block (real ViT has 197 tokens/image).
    S2 = 12
    hs2 = jax.random.normal(k1, (B, S2, intermediate_size), dtype=jnp.float32)
    it2 = jax.random.normal(k2, (B, S2, hidden_size), dtype=jnp.float32)

    out_rag = jax.block_until_ready(
        vit_output(hs2, it2, weight, bias, tm=16, mxu_dtype=None))
    ref_rag = vit_output_ref(hs2, it2, weight, bias)
    assert out_rag.shape == (B, S2, hidden_size)
    assert jnp.allclose(out_rag, ref_rag, atol=1e-4, rtol=1e-4)

    out_rag_fast = jax.block_until_ready(vit_output(hs2, it2, weight, bias, tm=16))
    ref_rag_fast = vit_output_ref(
        hs2.astype(jnp.bfloat16).astype(jnp.float32), it2,
        weight.astype(jnp.bfloat16).astype(jnp.float32), bias)
    assert jnp.allclose(out_rag_fast, ref_rag_fast, atol=2e-3, rtol=2e-3)

    print("KERNEL_OK")
</pallas_src>

<mosaic_0001>
module attributes {stable_mosaic.version = 11 : i64} {
  func.func @_vit_output_kernel(%arg0: i32, %arg1: memref<16x128xf32, #tpu.memory_space<vmem>>, %arg2: memref<128x64xf32, #tpu.memory_space<vmem>>, %arg3: memref<1x64xf32, #tpu.memory_space<vmem>>, %arg4: memref<16x64xf32, #tpu.memory_space<vmem>>, %arg5: memref<16x64xf32, #tpu.memory_space<vmem>>) attributes {dimension_semantics = [#tpu.dimension_semantics<parallel>], iteration_bounds = array<i64: 1>, scalar_prefetch = 0 : i64, scratch_operands = 0 : i64, tpu.core_type = #tpu.core_type<tc>, window_params = [{transform_indices = @transform_0, window_bounds = array<i64: 16, 128>}, {pipeline_mode = #tpu.pipeline_mode<synchronous>, transform_indices = @transform_1, window_bounds = array<i64: 128, 64>}, {pipeline_mode = #tpu.pipeline_mode<synchronous>, transform_indices = @transform_2, window_bounds = array<i64: 1, 64>}, {transform_indices = @transform_3, window_bounds = array<i64: 16, 64>}, {transform_indices = @transform_4, window_bounds = array<i64: 16, 64>}]} {
    %c0 = arith.constant 0 : index
    %c0_0 = arith.constant 0 : index
    %0 = vector.load %arg1[%c0, %c0_0] : memref<16x128xf32, #tpu.memory_space<vmem>>, vector<16x128xf32>
    %c0_1 = arith.constant 0 : index
    %c0_2 = arith.constant 0 : index
    %1 = vector.load %arg2[%c0_1, %c0_2] : memref<128x64xf32, #tpu.memory_space<vmem>>, vector<128x64xf32>
    %cst = arith.constant dense<0.000000e+00> : vector<16x64xf32>
    %2 = tpu.matmul %0, %1, %cst {dimension_numbers = #tpu.dot_dimension_numbers<[1], [0], [0], [1], [0, 0, 1, 1], [], []>} : vector<16x128xf32>, vector<128x64xf32>, vector<16x64xf32> -> vector<16x64xf32>
    %c0_3 = arith.constant 0 : index
    %c0_4 = arith.constant 0 : index
    %3 = vector.load %arg3[%c0_3, %c0_4] : memref<1x64xf32, #tpu.memory_space<vmem>>, vector<1x64xf32>
    %4 = vector.broadcast %3 : vector<1x64xf32> to vector<16x64xf32>
    %5 = arith.addf %2, %4 : vector<16x64xf32>
    %c0_5 = arith.constant 0 : index
    %c0_6 = arith.constant 0 : index
    %6 = vector.load %arg4[%c0_5, %c0_6] : memref<16x64xf32, #tpu.memory_space<vmem>>, vector<16x64xf32>
    %7 = arith.addf %5, %6 : vector<16x64xf32>
    %c0_7 = arith.constant 0 : index
    %c0_8 = arith.constant 0 : index
    %8 = vector.load %arg5[%c0_7, %c0_8] : memref<16x64xf32, #tpu.memory_space<vmem>>, vector<16x64xf32>
    tpu.vector_store %arg5[%c0_7, %c0_8], %7 {strides = array<i32>} : memref<16x64xf32, #tpu.memory_space<vmem>>, vector<16x64xf32>,
    return
  }
  func.func @transform_0(%arg0: i32) -> (i32, i32) {
    %c0_i32 = arith.constant 0 : i32
    %c0_i32_0 = arith.constant 0 : i32
    return %arg0, %c0_i32 : i32, i32
  }
  func.func @transform_1(%arg0: i32) -> (i32, i32) {
    %c0_i32 = arith.constant 0 : i32
    %c0_i32_0 = arith.constant 0 : i32
    %c0_i32_1 = arith.constant 0 : i32
    return %c0_i32, %c0_i32_0 : i32, i32
  }
  func.func @transform_2(%arg0: i32) -> (i32, i32) {
    %c0_i32 = arith.constant 0 : i32
    %c0_i32_0 = arith.constant 0 : i32
    %c0_i32_1 = arith.constant 0 : i32
    return %c0_i32, %c0_i32_0 : i32, i32
  }
  func.func @transform_3(%arg0: i32) -> (i32, i32) {
    %c0_i32 = arith.constant 0 : i32
    %c0_i32_0 = arith.constant 0 : i32
    return %arg0, %c0_i32 : i32, i32
  }
  func.func @transform_4(%arg0: i32) -> (i32, i32) {
    %c0_i32 = arith.constant 0 : i32
    %c0_i32_0 = arith.constant 0 : i32
    return %arg0, %c0_i32 : i32, i32
  }
}

</mosaic_0001>

<bundles_post_ra>
// kernel: tpu_custom_call.1
= control target key start
LH: loop header
LB: loop body
LE: loop exit
PB: predicated region body
PF: predicated region fallthrough
CT: control target
= control target key end

     0   :  { %s357_s0 = inlined_call_operand.vmem [shape: f32[16,128], index: 0, kind: input, shape index: {}]   ;;  %s358_s1 = inlined_call_operand.vmem [shape: f32[128,64], index: 1, kind: input, shape index: {}]   ;;  %s359_s2 = inlined_call_operand.vmem [shape: f32[1,64], index: 2, kind: input, shape index: {}]   ;;  %s360_s3 = inlined_call_operand.vmem [shape: f32[16,64], index: 3, kind: input, shape index: {}]   ;;  %s361_s4 = inlined_call_operand.hbm [shape: f32[16,64], index: 4, kind: output, shape index: {}]  }
   0x1   :  { %v20_v0 = vld [vmem:[%s358_s1] sm:$0xff]  ;;  %v21_v1 = vld [vmem:[%s358_s1 + $0x8] sm:$0xff]  ;;  %v22_v2 = vld [vmem:[%s358_s1 + $0x10] sm:$0xff] }
   0x2   :  { %v195_v3 = vpack.c.bf16 %v21_v1, %v20_v0  ;;  %v23_v4 = vld [vmem:[%s358_s1 + $0x18] sm:$0xff]  ;;  %v24_v6 = vld [vmem:[%s358_s1 + $0x20] sm:$0xff]  ;;  %v25_v7 = vld [vmem:[%s358_s1 + $0x28] sm:$0xff] }
   0x3   :  { %v199_v5 = vpack.c.bf16 %v23_v4, %v22_v2  ;;  %v203_v8 = vpack.c.bf16 %v25_v7, %v24_v6  ;;  %v18_v9 = vld [vmem:[%s357_s0] sm:$0xff]  ;;  %v26_v10 = vld [vmem:[%s358_s1 + $0x30] sm:$0xff]  ;;  %v27_v11 = vld [vmem:[%s358_s1 + $0x38] sm:$0xff] }
   0x4   :  { %196 = vmatprep.subr.bf16.mxu0 %v195_v3  ;;  %192 = vmatprep.mubr.f32.mxu0 %v18_v9 }
   0x5   :  { %198 = vmatpush3.bf16.msra.mxu0 %v195_v3 }
   0x6   :  { %200 = vmatprep.subr.bf16.mxu0 %v199_v5 }
   0x7   :  { %9 = vsyncpa [#allocation3], 0  ;;  %v207_v12 = vpack.c.bf16 %v27_v11, %v26_v10  ;;  %v28_v13 = vld [vmem:[%s358_s1 + $0x40] sm:$0xff]  ;;  %v29_v14 = vld [vmem:[%s358_s1 + $0x48] sm:$0xff]  ;;  %vm122_vm0 = vcmask 523264  }
   0x8   :  { %v211_v15 = vpack.c.bf16 %v29_v14, %v28_v13  ;;  %v30_v16 = vld [vmem:[%s358_s1 + $0x50] sm:$0xff]  ;;  %v31_v17 = vld [vmem:[%s358_s1 + $0x58] sm:$0xff]  ;;  %v32_v19 = vld [vmem:[%s358_s1 + $0x60] sm:$0xff] }
   0x9   :  { %202 = vmatpush3.bf16.msra.mxu0 %v199_v5  ;;  %v215_v18 = vpack.c.bf16 %v31_v17, %v30_v16  ;;  %v33_v20 = vld [vmem:[%s358_s1 + $0x68] sm:$0xff]  ;;  %v34_v22 = vld [vmem:[%s358_s1 + $0x70] sm:$0xff]  ;;  %v35_v23 = vld [vmem:[%s358_s1 + $0x78] sm:$0xff]  ;;  %s254_s1 = smov [#allocation2]  }
   0xa   :  { %204 = vmatprep.subr.bf16.mxu0 %v203_v8  ;;  %v219_v21 = vpack.c.bf16 %v33_v20, %v32_v19  ;;  %v223_v24 = vpack.c.bf16 %v35_v23, %v34_v22  ;;  %v19_v25 = vld [vmem:[%s357_s0 + $0x8] sm:$0xff]  ;;  %v141_v26 = vld [vmem:[%s359_s2] ss:$0 sm:$0xff]  ;;  %s130_s29 = sshll.u32 %s254_s1, 4  ;;  %s131_s29 = int_to_ptr.vmem [resolvable:$true] %s130_s29 }
   0xb   :  { %v119_v28 = vld [vmem:[%s360_s3 + $0x8] sm:$0xff]  ;;  %v118_v31 = vld [vmem:[%s360_s3] sm:$0xff]  ;;  %s230_s0 = scalar_lea.vmem %s131_s29, 256  ;;  %p235_p1 = scmp.lt.s32.totalorder %s131_s29, %s131_s29 }
   0xc   :  { %p231_p0 = scmp.ne.s32.totalorder %s131_s29, %s230_s0  ;;  %p236_p2 = scmp.lt.s32.totalorder %s230_s0, %s230_s0 }
   0xd   :  { %206 = vmatpush3.bf16.msra.mxu0 %v203_v8 }
   0xe   :  { %208 = vmatprep.subr.bf16.mxu0 %v207_v12  ;;  %p237_p3 = por %p236_p2, %p235_p1 }
  0x10   :  { %p238_p4 = pnand %p237_p3, %p231_p0 }
  0x11   :  { %210 = vmatpush3.bf16.msra.mxu0 %v207_v12 }
  0x12   :  { %212 = vmatprep.subr.bf16.mxu0 %v211_v15 }
  0x15   :  { %214 = vmatpush3.bf16.msra.mxu0 %v211_v15 }
  0x16   :  { %216 = vmatprep.subr.bf16.mxu0 %v215_v18 }
  0x19   :  { %218 = vmatpush3.bf16.msra.mxu0 %v215_v18 }
  0x1a   :  { %220 = vmatprep.subr.bf16.mxu0 %v219_v21 }
  0x1d   :  { %222 = vmatpush3.bf16.msra.mxu0 %v219_v21 }
  0x1e   :  { %224 = vmatprep.subr.bf16.mxu0 %v223_v24 }
  0x21   :  { %226 = vmatpush3.bf16.msra.mxu0 %v223_v24 }
  0x24   :  { %193 = vmatmul.mubr.f32.vlgmr.msra.gmra.mrb[0].mxu0 %v19_v25 }
  0xf7   :  { %v194_v27 = vpop.f32.mrb[0].mxu0 }
  0xf8   :  { %v115_v29 = vadd.f32 %v194_v27, %v141_v26  ;;  %v109_v30 = vpop.f32.mrb[1].mxu0 }
  0xf9   :  { %v110_v32 = vadd.f32 %v141_v26, %v109_v30 }
  0xfa   :  { %v121_v33 = vadd.f32 %v119_v28, %v115_v29 }
  0xfb   :  { %v120_v34 = vadd.f32 %v118_v31, %v110_v32 }
  0xfc   :  { %124 = vst.msk [vmem:[#allocation2 + $0x8] sm:$0xff] %vm122_vm0, %v121_v33 }
  0xfd   :  { %123 = vst.msk [vmem:[#allocation2] sm:$0xff] %vm122_vm0, %v120_v34 }
  0xfe   :  { %241 = shalt.err (!%p238_p4)
}
  0xff   :  { %s242_s7 = scalar_lea.hbm %s361_s4, 256 }
 0x100   :  { %p243_p5 = scmp.ne.s32.totalorder %s361_s4, %s242_s7  ;;  %p246_p6 = scmp.lt.u32.totalorder %s242_s7, %s361_s4 }
 0x102   :  { %p248_p7 = pnand %p246_p6, %p243_p5 }
 0x104   :  { %251 = shalt.err (!%p248_p7)
}
 0x105   :  { %s255_s11 = smov 128   ;;  %s256_s12 = smov 8  }
 0x106   :  { %136 = dma.vmem_to_hbm [thread:$0]  %s131_s29, 256, %s361_s4, [#allocation3], %s255_s11, %s255_s11, %s256_s12  }
 0x107   :  { %252 = dma.done.wait [#allocation3], 256  }
 0x108   :  { %253 = vsyncadd [#allocation3], 4294967040 }
 0x109   :  { %140 = vsyncpa [#allocation3], 1 }

</bundles_post_ra>
